<compile_context>
chip_gen: v5e
topology: v5e:2x2
jax: 0.10.0
libtpu: 0.0.40
codegen_flags: <defaults>
</compile_context>

<pallas_src>
import functools

import jax
import jax.numpy as jnp
from jax.experimental import pallas as pl
from jax.experimental.pallas import tpu as pltpu


def _round_up(x, m):
    return ((x + m - 1) // m) * m


def _choose_batch_tiling(B, max_tile=1024):
    """Return (B_TILE, Bp).

    B_TILE is a multiple of 16 (bf16 packs 16 sublanes/vreg). For batches > 256 we use
    an even number (>=2) of grid steps so the 'parallel' grid axis feeds both v7x
    TensorCores, with tiles up to `max_tile` rows to amortize per-grid-step overhead.
    """
    if B <= 256:
        bt = _round_up(max(B, 1), 16)
        return bt, bt
    steps = max(2, -(-B // max_tile))      # ceil-div
    if steps % 2:
        steps += 1                         # even step count -> balanced megacore split
    bt = _round_up(-(-B // steps), 16)
    return bt, bt * steps


def sac_actor_kernel(x_ref, w1_ref, b1_ref, w2_ref, b2_ref, wh_ref, bh_ref,
                     out_ref, *, n_actions):
    # x: (B_TILE, D) bf16     w1: (D, fc1) bf16     w2: (fc1, fc2) bf16
    # wh: (fc2, HP) bf16 (cols [0,A)=mu, [A,2A)=log_sigma, rest zero padding)
    # biases fp32, out: (B_TILE, HP) bf16
    x = x_ref[...]

    # fc1 + ReLU (fp32 accumulate, fp32 elementwise)
    h1 = jnp.dot(x, w1_ref[...], preferred_element_type=jnp.float32) + b1_ref[...]
    h1 = jnp.maximum(h1, 0.0)

    # fc2 + ReLU
    h2 = jnp.dot(h1.astype(w2_ref.dtype), w2_ref[...],
                 preferred_element_type=jnp.float32) + b2_ref[...]
    h2 = jnp.maximum(h2, 0.0)

    # fused head: one lane-dense matmul for [mu | log_sigma | zero padding]
    head = jnp.dot(h2.astype(wh_ref.dtype), wh_ref[...],
                   preferred_element_type=jnp.float32) + bh_ref[...]

    # sigma columns: exp(clamp(log_sigma, -20, 2)) in fp32; mu / padding pass through.
    col = jax.lax.broadcasted_iota(jnp.int32, head.shape, 1)
    sigma = jnp.exp(jnp.clip(head, -20.0, 2.0))
    is_sigma_col = (col >= n_actions) & (col < 2 * n_actions)
    out_ref[...] = jnp.where(is_sigma_col, sigma, head).astype(out_ref.dtype)


@functools.partial(jax.jit, static_argnames=("n_actions",))
def sac_actor_forward(state, kparams, *, n_actions):
    """state: (B, input_dim) fp32; kparams from prepare_params. Returns (mu, sigma) fp32."""
    w1, b1, w2, b2, wh, bh = kparams
    B, D = state.shape
    HP = wh.shape[1]                      # padded fused-head width (multiple of 128)

    B_TILE, Bp = _choose_batch_tiling(B)

    # Single fused pad (batch rows only) + bf16 cast for the MXU input.
    x = jnp.pad(state.astype(jnp.bfloat16), ((0, Bp - B), (0, 0)))

    grid = (Bp // B_TILE,)
    kernel = functools.partial(sac_actor_kernel, n_actions=n_actions)

    out = pl.pallas_call(
        kernel,
        out_shape=jax.ShapeDtypeStruct((Bp, HP), jnp.bfloat16),
        grid=grid,
        in_specs=[
            pl.BlockSpec((B_TILE, D), lambda i: (i, 0)),    # state tile per grid step
            pl.BlockSpec(w1.shape, lambda i: (0, 0)),       # weights resident in VMEM
            pl.BlockSpec(b1.shape, lambda i: (0, 0)),
            pl.BlockSpec(w2.shape, lambda i: (0, 0)),
            pl.BlockSpec(b2.shape, lambda i: (0, 0)),
            pl.BlockSpec(wh.shape, lambda i: (0, 0)),
            pl.BlockSpec(bh.shape, lambda i: (0, 0)),
        ],
        out_specs=pl.BlockSpec((B_TILE, HP), lambda i: (i, 0)),
        compiler_params=pltpu.CompilerParams(dimension_semantics=("parallel",)),
    )(x, w1, b1, w2, b2, wh, bh)

    mu = out[:B, :n_actions].astype(jnp.float32)
    sigma = out[:B, n_actions:2 * n_actions].astype(jnp.float32)
    return mu, sigma


def init_params(key, input_dim, fc1_dims, fc2_dims, n_actions):
    """PyTorch-Linear-style init: U(-1/sqrt(fan_in), 1/sqrt(fan_in)), (in, out) layout."""
    def linear(key, fan_in, fan_out):
        kw, kb = jax.random.split(key)
        bound = 1.0 / jnp.sqrt(jnp.float32(fan_in))
        w = jax.random.uniform(kw, (fan_in, fan_out), jnp.float32, -bound, bound)
        b = jax.random.uniform(kb, (1, fan_out), jnp.float32, -bound, bound)
        return w, b

    k1, k2, k3, k4 = jax.random.split(key, 4)
    w1, b1 = linear(k1, input_dim, fc1_dims)
    w2, b2 = linear(k2, fc1_dims, fc2_dims)
    wmu, bmu = linear(k3, fc2_dims, n_actions)
    ws, bs = linear(k4, fc2_dims, n_actions)
    return (w1, b1, w2, b2, wmu, bmu, ws, bs)


def prepare_params(params):
    """Fuse mu/sigma heads, pad head to a lane-dense width, cast matmul weights to bf16."""
    w1, b1, w2, b2, wmu, bmu, ws, bs = params
    fc2, n_actions = wmu.shape

    HP = _round_up(max(2 * n_actions, 128), 128)   # padded fused-head width

    wh = jnp.concatenate([wmu, ws], axis=1)        # (fc2, 2*n_actions)
    bh = jnp.concatenate([bmu, bs], axis=1)        # (1, 2*n_actions)
    whp = jnp.zeros((fc2, HP), jnp.float32).at[:, :2 * n_actions].set(wh)
    bhp = jnp.zeros((1, HP), jnp.float32).at[:, :2 * n_actions].set(bh)

    kparams = (w1.astype(jnp.bfloat16), b1,        # w1 stays at natural (D, fc1) shape
               w2.astype(jnp.bfloat16), b2,
               whp.astype(jnp.bfloat16), bhp)
    return kparams, n_actions


def reference_forward(state, params):
    w1, b1, w2, b2, wmu, bmu, ws, bs = params
    h1 = jnp.maximum(state @ w1 + b1, 0.0)
    h2 = jnp.maximum(h1 @ w2 + b2, 0.0)
    mu = h2 @ wmu + bmu
    log_sigma = jnp.clip(h2 @ ws + bs, -20.0, 2.0)
    return mu, jnp.exp(log_sigma)


def _check(state, params, kparams, n_actions, atol=5e-2, rtol=5e-2):
    mu, sigma = sac_actor_forward(state, kparams, n_actions=n_actions)
    jax.block_until_ready((mu, sigma))
    mu_ref, sigma_ref = reference_forward(state, params)
    assert mu.shape == (state.shape[0], n_actions)
    assert sigma.shape == (state.shape[0], n_actions)
    # bf16 matmul inputs + bf16 output store (fp32 accumulation / elementwise) -> loosened tol.
    assert jnp.allclose(mu, mu_ref, atol=atol, rtol=rtol), (mu, mu_ref)
    assert jnp.allclose(sigma, sigma_ref, atol=atol, rtol=rtol), (sigma, sigma_ref)
    assert bool(jnp.all(sigma > 0))


if __name__ == "__main__":
    # Small shapes consistent with the module defaults: state = (batch, *input_dims)
    input_dim = 16       # input_dims = (16,)
    fc1_dims = 256
    fc2_dims = 256
    n_actions = 2

    key = jax.random.PRNGKey(0)
    k_state, k_state2, k_params = jax.random.split(key, 3)

    params = init_params(k_params, input_dim, fc1_dims, fc2_dims, n_actions)
    kparams, na = prepare_params(params)

    # Inference-sized batch (single 16-row tile).
    state = jax.random.normal(k_state, (8, input_dim), dtype=jnp.float32)
    _check(state, params, kparams, na)

    # Larger batch exercising the multi-step (2-tile) grid + batch padding path.
    state2 = jax.random.normal(k_state2, (400, input_dim), dtype=jnp.float32)
    _check(state2, params, kparams, na)

    # TODO(synk): sample_normal (rsample / log_prob / tanh squash) is stochastic policy
    # sampling, not part of forward(); it stays in host-side JAX if needed. Optimizer /
    # device placement are likewise out of scope for the forward kernel.

    print("KERNEL_OK")
</pallas_src>

<mosaic_0001>
module attributes {stable_mosaic.version = 11 : i64} {
  func.func @sac_actor_kernel(%arg0: i32, %arg1: memref<16x16xbf16, #tpu.memory_space<vmem>>, %arg2: memref<16x256xbf16, #tpu.memory_space<vmem>>, %arg3: memref<1x256xf32, #tpu.memory_space<vmem>>, %arg4: memref<256x256xbf16, #tpu.memory_space<vmem>>, %arg5: memref<1x256xf32, #tpu.memory_space<vmem>>, %arg6: memref<256x128xbf16, #tpu.memory_space<vmem>>, %arg7: memref<1x128xf32, #tpu.memory_space<vmem>>, %arg8: memref<16x128xbf16, #tpu.memory_space<vmem>>) attributes {dimension_semantics = [#tpu.dimension_semantics<parallel>], iteration_bounds = array<i64: 1>, scalar_prefetch = 0 : i64, scratch_operands = 0 : i64, tpu.core_type = #tpu.core_type<tc>, window_params = [{transform_indices = @transform_0, window_bounds = array<i64: 16, 16>}, {pipeline_mode = #tpu.pipeline_mode<synchronous>, transform_indices = @transform_1, window_bounds = array<i64: 16, 256>}, {pipeline_mode = #tpu.pipeline_mode<synchronous>, transform_indices = @transform_2, window_bounds = array<i64: 1, 256>}, {pipeline_mode = #tpu.pipeline_mode<synchronous>, transform_indices = @transform_3, window_bounds = array<i64: 256, 256>}, {pipeline_mode = #tpu.pipeline_mode<synchronous>, transform_indices = @transform_4, window_bounds = array<i64: 1, 256>}, {pipeline_mode = #tpu.pipeline_mode<synchronous>, transform_indices = @transform_5, window_bounds = array<i64: 256, 128>}, {pipeline_mode = #tpu.pipeline_mode<synchronous>, transform_indices = @transform_6, window_bounds = array<i64: 1, 128>}, {transform_indices = @transform_7, window_bounds = array<i64: 16, 128>}]} {
    %c0 = arith.constant 0 : index
    %c0_0 = arith.constant 0 : index
    %0 = vector.load %arg1[%c0, %c0_0] : memref<16x16xbf16, #tpu.memory_space<vmem>>, vector<16x16xbf16>
    %c0_1 = arith.constant 0 : index
    %c0_2 = arith.constant 0 : index
    %1 = vector.load %arg2[%c0_1, %c0_2] : memref<16x256xbf16, #tpu.memory_space<vmem>>, vector<16x256xbf16>
    %cst = arith.constant dense<0.000000e+00> : vector<16x256xf32>
    %2 = tpu.matmul %0, %1, %cst {dimension_numbers = #tpu.dot_dimension_numbers<[1], [0], [0], [1], [0, 0, 1, 1], [], []>} : vector<16x16xbf16>, vector<16x256xbf16>, vector<16x256xf32> -> vector<16x256xf32>
    %c0_3 = arith.constant 0 : index
    %c0_4 = arith.constant 0 : index
    %3 = vector.load %arg3[%c0_3, %c0_4] : memref<1x256xf32, #tpu.memory_space<vmem>>, vector<1x256xf32>
    %4 = vector.broadcast %3 : vector<1x256xf32> to vector<16x256xf32>
    %5 = arith.addf %2, %4 : vector<16x256xf32>
    %cst_5 = arith.constant 0.000000e+00 : f32
    %6 = vector.broadcast %cst_5 : f32 to vector<16x256xf32>
    %7 = arith.maximumf %5, %6 : vector<16x256xf32>
    %8 = arith.truncf %7 : vector<16x256xf32> to vector<16x256xbf16>
    %c0_6 = arith.constant 0 : index
    %c0_7 = arith.constant 0 : index
    %9 = vector.load %arg4[%c0_6, %c0_7] : memref<256x256xbf16, #tpu.memory_space<vmem>>, vector<256x256xbf16>
    %cst_8 = arith.constant dense<0.000000e+00> : vector<16x256xf32>
    %10 = tpu.matmul %8, %9, %cst_8 {dimension_numbers = #tpu.dot_dimension_numbers<[1], [0], [0], [1], [0, 0, 1, 1], [], []>} : vector<16x256xbf16>, vector<256x256xbf16>, vector<16x256xf32> -> vector<16x256xf32>
    %c0_9 = arith.constant 0 : index
    %c0_10 = arith.constant 0 : index
    %11 = vector.load %arg5[%c0_9, %c0_10] : memref<1x256xf32, #tpu.memory_space<vmem>>, vector<1x256xf32>
    %12 = vector.broadcast %11 : vector<1x256xf32> to vector<16x256xf32>
    %13 = arith.addf %10, %12 : vector<16x256xf32>
    %cst_11 = arith.constant 0.000000e+00 : f32
    %14 = vector.broadcast %cst_11 : f32 to vector<16x256xf32>
    %15 = arith.maximumf %13, %14 : vector<16x256xf32>
    %16 = arith.truncf %15 : vector<16x256xf32> to vector<16x256xbf16>
    %c0_12 = arith.constant 0 : index
    %c0_13 = arith.constant 0 : index
    %17 = vector.load %arg6[%c0_12, %c0_13] : memref<256x128xbf16, #tpu.memory_space<vmem>>, vector<256x128xbf16>
    %cst_14 = arith.constant dense<0.000000e+00> : vector<16x128xf32>
    %18 = tpu.matmul %16, %17, %cst_14 {dimension_numbers = #tpu.dot_dimension_numbers<[1], [0], [0], [1], [0, 0, 1, 1], [], []>} : vector<16x256xbf16>, vector<256x128xbf16>, vector<16x128xf32> -> vector<16x128xf32>
    %c0_15 = arith.constant 0 : index
    %c0_16 = arith.constant 0 : index
    %19 = vector.load %arg7[%c0_15, %c0_16] : memref<1x128xf32, #tpu.memory_space<vmem>>, vector<1x128xf32>
    %20 = vector.broadcast %19 : vector<1x128xf32> to vector<16x128xf32>
    %21 = arith.addf %18, %20 : vector<16x128xf32>
    %22 = tpu.iota {dimensions = array<i32: 1>} : vector<16x128xi32>
    %cst_17 = arith.constant -2.000000e+01 : f32
    %cst_18 = arith.constant 2.000000e+00 : f32
    %23 = vector.broadcast %cst_17 : f32 to vector<16x128xf32>
    %24 = arith.maximumf %23, %21 : vector<16x128xf32>
    %25 = vector.broadcast %cst_18 : f32 to vector<16x128xf32>
    %26 = arith.minimumf %25, %24 : vector<16x128xf32>
    %27 = math.exp %26 : vector<16x128xf32>
    %c2_i32 = arith.constant 2 : i32
    %28 = vector.broadcast %c2_i32 : i32 to vector<16x128xi32>
    %29 = arith.cmpi sge, %22, %28 : vector<16x128xi32>
    %c4_i32 = arith.constant 4 : i32
    %30 = vector.broadcast %c4_i32 : i32 to vector<16x128xi32>
    %31 = arith.cmpi slt, %22, %30 : vector<16x128xi32>
    %32 = arith.andi %29, %31 : vector<16x128xi1>
    %33 = arith.select %32, %27, %21 : vector<16x128xi1>, vector<16x128xf32>
    %34 = arith.truncf %33 : vector<16x128xf32> to vector<16x128xbf16>
    %c0_19 = arith.constant 0 : index
    %c0_20 = arith.constant 0 : index
    %35 = vector.load %arg8[%c0_19, %c0_20] : memref<16x128xbf16, #tpu.memory_space<vmem>>, vector<16x128xbf16>
    tpu.vector_store %arg8[%c0_19, %c0_20], %34 {strides = array<i32>} : memref<16x128xbf16, #tpu.memory_space<vmem>>, vector<16x128xbf16>,
    return
  }
  func.func @transform_0(%arg0: i32) -> (i32, i32) {
    %c0_i32 = arith.constant 0 : i32
    %c0_i32_0 = arith.constant 0 : i32
    return %arg0, %c0_i32 : i32, i32
  }
  func.func @transform_1(%arg0: i32) -> (i32, i32) {
    %c0_i32 = arith.constant 0 : i32
    %c0_i32_0 = arith.constant 0 : i32
    %c0_i32_1 = arith.constant 0 : i32
    return %c0_i32, %c0_i32_0 : i32, i32
  }
  func.func @transform_2(%arg0: i32) -> (i32, i32) {
    %c0_i32 = arith.constant 0 : i32
    %c0_i32_0 = arith.constant 0 : i32
    %c0_i32_1 = arith.constant 0 : i32
    return %c0_i32, %c0_i32_0 : i32, i32
  }
  func.func @transform_3(%arg0: i32) -> (i32, i32) {
    %c0_i32 = arith.constant 0 : i32
    %c0_i32_0 = arith.constant 0 : i32
    %c0_i32_1 = arith.constant 0 : i32
    return %c0_i32, %c0_i32_0 : i32, i32
  }
  func.func @transform_4(%arg0: i32) -> (i32, i32) {
    %c0_i32 = arith.constant 0 : i32
    %c0_i32_0 = arith.constant 0 : i32
    %c0_i32_1 = arith.constant 0 : i32
    return %c0_i32, %c0_i32_0 : i32, i32
  }
  func.func @transform_5(%arg0: i32) -> (i32, i32) {
    %c0_i32 = arith.constant 0 : i32
    %c0_i32_0 = arith.constant 0 : i32
    %c0_i32_1 = arith.constant 0 : i32
    return %c0_i32, %c0_i32_0 : i32, i32
  }
  func.func @transform_6(%arg0: i32) -> (i32, i32) {
    %c0_i32 = arith.constant 0 : i32
    %c0_i32_0 = arith.constant 0 : i32
    %c0_i32_1 = arith.constant 0 : i32
    return %c0_i32, %c0_i32_0 : i32, i32
  }
  func.func @transform_7(%arg0: i32) -> (i32, i32) {
    %c0_i32 = arith.constant 0 : i32
    %c0_i32_0 = arith.constant 0 : i32
    return %arg0, %c0_i32 : i32, i32
  }
}

</mosaic_0001>

<bundles_post_ra>
// kernel: sac_actor_forward.1
= control target key start
LH: loop header
LB: loop body
LE: loop exit
PB: predicated region body
PF: predicated region fallthrough
CT: control target
= control target key end

     0   :  { %12 = vsyncpa [#allocation3], 0  ;;  %s973_s0 = inlined_call_operand.vmem [shape: bf16[16,16], index: 0, kind: input, shape index: {}]   ;;  %s974_s1 = inlined_call_operand.vmem [shape: bf16[16,256], index: 1, kind: input, shape index: {}]   ;;  %s975_s2 = inlined_call_operand.vmem [shape: f32[1,256], index: 2, kind: input, shape index: {}]   ;;  %s976_s3 = inlined_call_operand.hbm [shape: bf16[256,256], index: 3, kind: input, shape index: {}]   ;;  %s977_s4 = inlined_call_operand.vmem [shape: f32[1,256], index: 4, kind: input, shape index: {}]   ;;  %s978_s5 = inlined_call_operand.hbm [shape: bf16[256,128], index: 5, kind: input, shape index: {}]   ;;  %s979_s6 = inlined_call_operand.vmem [shape: f32[1,128], index: 6, kind: input, shape index: {}]   ;;  %s980_s7 = inlined_call_operand.vmem [shape: bf16[16,128], index: 7, kind: output, shape index: {}]  }
   0x1   :  { %s24_s26 = sshll.u32 %s976_s3, 4  ;;  %s25_s26 = int_to_ptr.hbm [resolvable:$true] %s24_s26 }
   0x2   :  { %13 = vsyncpa [#allocation5], 0  ;;  %s892_s27 = smov [#allocation2]   ;;  %s39_s8 = sshll.u32 %s978_s5, 4  ;;  %s40_s8 = int_to_ptr.hbm [resolvable:$true] %s39_s8 }
   0x3   :  { %s26_s28 = sshll.u32 %s892_s27, 4  ;;  %s893_s9 = smov 128   ;;  %s27_s28 = int_to_ptr.vmem [resolvable:$true] %s26_s28 }
   0x4   :  { %s894_s10 = smov 8   ;;  %s895_s11 = smov [#allocation4]  }
   0x5   :  { %32 = dma.hbm_to_vmem [thread:$0]  %s25_s26, 4096, %s27_s28, [#allocation3], %s893_s9, %s893_s9, %s894_s10  }
   0x6   :  { %s41_s12 = sshll.u32 %s895_s11, 4  ;;  %s896_s13 = smov 64   ;;  %s42_s12 = int_to_ptr.vmem [resolvable:$true] %s41_s12 }
   0x7   :  { %s897_s14 = smov 4  }
   0x8   :  { %47 = dma.hbm_to_vmem [thread:$0]  %s40_s8, 2048, %s42_s12, [#allocation5], %s896_s13, %s896_s13, %s897_s14  }
   0x9   :  { %888 = dma.done.wait [#allocation3], 4096  }
   0xa   :  { %889 = vsyncadd [#allocation3], 4294963200 }
   0xb   :  { %890 = dma.done.wait [#allocation5], 2048  }
   0xc   :  { %891 = vsyncadd [#allocation5], 4294965248  ;;  %v573_v0 = vld [vmem:[%s974_s1] sm:$0xf]  ;;  %v775_v1 = vld [vmem:[%s974_s1 + $0x4] sm:$0xf0] }
   0xd   :  { %v774_v2 = vld [vmem:[%s974_s1 + $0x4] sm:$0xf]  ;;  %v574_v3 = vor.u32 %v775_v1, %v573_v0  ;;  %v575_v4 = vld [vmem:[%s974_s1 + $0x8] sm:$0xf0]  ;;  %vm84_vm0 = vcmask 130048  }
   0xe   :  { %v773_v5 = vld [vmem:[%s973_s0] sm:$0xff]  ;;  %v639_v6 = vld [vmem:[#allocation2 + $0x70] sm:$0xf]  ;;  %v578_v7 = vor.u32 %v774_v2, %v575_v4  ;;  %v791_v8 = vld [vmem:[#allocation2 + $0x74] sm:$0xf0] }
   0xf   :  { %v703_v9 = vld [vmem:[#allocation2 + $0xf0] sm:$0xf]  ;;  %v807_v10 = vld [vmem:[#allocation2 + $0xf4] sm:$0xf0]  ;;  %95 = vmatpush.bf16.msra.mxu0 %v574_v3  ;;  %v640_v11 = vor.u32 %v791_v8, %v639_v6  ;;  %v790_v13 = vld [vmem:[#allocation2 + $0x74] sm:$0xf] }
  0x10   :  { %v704_v12 = vor.u32 %v807_v10, %v703_v9  ;;  %v641_v14 = vld [vmem:[#allocation2 + $0x78] sm:$0xf0]  ;;  %v806_v15 = vld [vmem:[#allocation2 + $0xf4] sm:$0xf]  ;;  %109 = vmatpush.bf16.msra.mxu1 %v578_v7  ;;  %v631_v18 = vld [vmem:[#allocation2 + $0x60] sm:$0xf] }
  0x11   :  { %v644_v16 = vor.u32 %v790_v13, %v641_v14  ;;  %v705_v17 = vld [vmem:[#allocation2 + $0xf8] sm:$0xf0]  ;;  %v789_v19 = vld [vmem:[#allocation2 + $0x64] sm:$0xf0]  ;;  %320 = vmatpush.bf16.msra.mxu2 %v640_v11  ;;  %v695_v22 = vld [vmem:[#allocation2 + $0xe0] sm:$0xf] }
  0x12   :  { %334 = vmatpush.bf16.msra.mxu3 %v704_v12  ;;  %v708_v20 = vor.u32 %v806_v15, %v705_v17  ;;  %v632_v21 = vor.u32 %v789_v19, %v631_v18  ;;  %v805_v23 = vld [vmem:[#allocation2 + $0xe4] sm:$0xf0]  ;;  %v788_v24 = vld [vmem:[#allocation2 + $0x64] sm:$0xf]  ;;  %579 = vmatmul.msk.bf16.vlgmr.msra.gmra.mxu0 %vm84_vm0, %v773_v5  ;;  %v633_v26 = vld [vmem:[#allocation2 + $0x68] sm:$0xf0] }
  0x13   :  { %v696_v25 = vor.u32 %v805_v23, %v695_v22  ;;  %v804_v27 = vld [vmem:[#allocation2 + $0xe4] sm:$0xf]  ;;  %v697_v28 = vld [vmem:[#allocation2 + $0xe8] sm:$0xf0]  ;;  %580 = vmatmul.msk.bf16.vlgmr.msra.gmra.mxu1 %vm84_vm0, %v773_v5  ;;  %348 = vmatpush.bf16.msrb.mxu0 %v644_v16  ;;  %v636_v29 = vor.u32 %v788_v24, %v633_v26  ;;  %v623_v30 = vld [vmem:[#allocation2 + $0x50] sm:$0xf] }
  0x14   :  { %v787_v31 = vld [vmem:[#allocation2 + $0x54] sm:$0xf0]  ;;  %v687_v32 = vld [vmem:[#allocation2 + $0xd0] sm:$0xf]  ;;  %362 = vmatpush.bf16.msrb.mxu1 %v708_v20  ;;  %v700_v33 = vor.u32 %v804_v27, %v697_v28  ;;  %v786_v35 = vld [vmem:[#allocation2 + $0x54] sm:$0xf] }
  0x15   :  { %v803_v34 = vld [vmem:[#allocation2 + $0xd4] sm:$0xf0]  ;;  %v625_v36 = vld [vmem:[#allocation2 + $0x58] sm:$0xf0]  ;;  %321 = vmatpush.bf16.msra.mxu2 %v632_v21  ;;  %v624_v37 = vor.u32 %v787_v31, %v623_v30  ;;  %v802_v39 = vld [vmem:[#allocation2 + $0xd4] sm:$0xf] }
  0x16   :  { %335 = vmatpush.bf16.msra.mxu3 %v696_v25  ;;  %v688_v38 = vor.u32 %v803_v34, %v687_v32  ;;  %v689_v40 = vld [vmem:[#allocation2 + $0xd8] sm:$0xf0]  ;;  %v615_v41 = vld [vmem:[#allocation2 + $0x40] sm:$0xf]  ;;  %v785_v42 = vld [vmem:[#allocation2 + $0x44] sm:$0xf0]  ;;  %v628_v45 = vor.u32 %v786_v35, %v625_v36 }
  0x17   :  { %v679_v43 = vld [vmem:[#allocation2 + $0xc0] sm:$0xf]  ;;  %v801_v44 = vld [vmem:[#allocation2 + $0xc4] sm:$0xf0]  ;;  %349 = vmatpush.bf16.msrb.mxu0 %v636_v29  ;;  %v692_v46 = vor.u32 %v802_v39, %v689_v40  ;;  %v784_v47 = vld [vmem:[#allocation2 + $0x44] sm:$0xf]  ;;  %v616_v49 = vor.u32 %v785_v42, %v615_v41 }
  0x18   :  { %363 = vmatpush.bf16.msrb.mxu1 %v700_v33  ;;  %v617_v48 = vld [vmem:[#allocation2 + $0x48] sm:$0xf0]  ;;  %v680_v50 = vor.u32 %v801_v44, %v679_v43  ;;  %v800_v51 = vld [vmem:[#allocation2 + $0xc4] sm:$0xf]  ;;  %v607_v55 = vld [vmem:[#allocation2 + $0x30] sm:$0xf] }
  0x19   :  { %322 = vmatpush.bf16.msra.mxu2 %v624_v37  ;;  %v681_v52 = vld [vmem:[#allocation2 + $0xc8] sm:$0xf0]  ;;  %v620_v53 = vor.u32 %v784_v47, %v617_v48  ;;  %v783_v56 = vld [vmem:[#allocation2 + $0x34] sm:$0xf0]  ;;  %v671_v57 = vld [vmem:[#allocation2 + $0xb0] sm:$0xf] }
  0x1a   :  { %336 = vmatpush.bf16.msra.mxu3 %v688_v38  ;;  %v684_v54 = vor.u32 %v800_v51, %v681_v52  ;;  %v608_v58 = vor.u32 %v783_v56, %v607_v55  ;;  %v799_v59 = vld [vmem:[#allocation2 + $0xb4] sm:$0xf0]  ;;  %v782_v60 = vld [vmem:[#allocation2 + $0x34] sm:$0xf]  ;;  %v609_v61 = vld [vmem:[#allocation2 + $0x38] sm:$0xf0] }
  0x1b   :  { %350 = vmatpush.bf16.msrb.mxu0 %v628_v45  ;;  %v672_v62 = vor.u32 %v799_v59, %v671_v57  ;;  %v612_v63 = vor.u32 %v782_v60, %v609_v61  ;;  %v798_v0 = vld [vmem:[#allocation2 + $0xb4] sm:$0xf]  ;;  %v673_v1 = vld [vmem:[#allocation2 + $0xb8] sm:$0xf0]  ;;  %v599_v3 = vld [vmem:[#allocation2 + $0x20] sm:$0xf] }
  0x1c   :  { %364 = vmatpush.bf16.msrb.mxu1 %v692_v46  ;;  %v676_v2 = vor.u32 %v798_v0, %v673_v1  ;;  %v781_v4 = vld [vmem:[#allocation2 + $0x24] sm:$0xf0]  ;;  %v663_v6 = vld [vmem:[#allocation2 + $0xa0] sm:$0xf]  ;;  %v780_v8 = vld [vmem:[#allocation2 + $0x24] sm:$0xf] }
  0x1d   :  { %323 = vmatpush.bf16.msra.mxu2 %v616_v49  ;;  %v600_v5 = vor.u32 %v781_v4, %v599_v3  ;;  %v797_v7 = vld [vmem:[#allocation2 + $0xa4] sm:$0xf0]  ;;  %v601_v10 = vld [vmem:[#allocation2 + $0x28] sm:$0xf0]  ;;  %v796_v11 = vld [vmem:[#allocation2 + $0xa4] sm:$0xf] }
  0x1e   :  { %337 = vmatpush.bf16.msra.mxu3 %v680_v50  ;;  %v664_v9 = vor.u32 %v797_v7, %v663_v6  ;;  %v665_v12 = vld [vmem:[#allocation2 + $0xa8] sm:$0xf0]  ;;  %v604_v13 = vor.u32 %v780_v8, %v601_v10  ;;  %v591_v15 = vld [vmem:[#allocation2 + $0x10] sm:$0xf]  ;;  %v779_v16 = vld [vmem:[#allocation2 + $0x14] sm:$0xf0] }
  0x1f   :  { %351 = vmatpush.bf16.msrb.mxu0 %v620_v53  ;;  %v668_v14 = vor.u32 %v796_v11, %v665_v12  ;;  %v655_v17 = vld [vmem:[#allocation2 + $0x90] sm:$0xf]  ;;  %v592_v18 = vor.u32 %v779_v16, %v591_v15  ;;  %v795_v19 = vld [vmem:[#allocation2 + $0x94] sm:$0xf0]  ;;  %v778_v20 = vld [vmem:[#allocation2 + $0x14] sm:$0xf] }
  0x20   :  { %365 = vmatpush.bf16.msrb.mxu1 %v684_v54  ;;  %v593_v21 = vld [vmem:[#allocation2 + $0x18] sm:$0xf0]  ;;  %v656_v22 = vor.u32 %v795_v19, %v655_v17  ;;  %v794_v24 = vld [vmem:[#allocation2 + $0x94] sm:$0xf]  ;;  %v583_v27 = vld [vmem:[#allocation2] sm:$0xf] }
  0x21   :  { %324 = vmatpush.bf16.msra.mxu2 %v608_v58  ;;  %v596_v23 = vor.u32 %v778_v20, %v593_v21  ;;  %v657_v25 = vld [vmem:[#allocation2 + $0x98] sm:$0xf0]  ;;  %v777_v28 = vld [vmem:[#allocation2 + $0x4] sm:$0xf0]  ;;  %v647_v29 = vld [vmem:[#allocation2 + $0x80] sm:$0xf] }
  0x22   :  { %338 = vmatpush.bf16.msra.mxu3 %v672_v62  ;;  %v660_v26 = vor.u32 %v794_v24, %v657_v25  ;;  %v584_v30 = vor.u32 %v777_v28, %v583_v27  ;;  %v793_v31 = vld [vmem:[#allocation2 + $0x84] sm:$0xf0]  ;;  %v776_v32 = vld [vmem:[#allocation2 + $0x4] sm:$0xf]  ;;  %v585_v33 = vld [vmem:[#allocation2 + $0x8] sm:$0xf0] }
  0x23   :  { %352 = vmatpush.bf16.msrb.mxu0 %v612_v63  ;;  %v648_v34 = vor.u32 %v793_v31, %v647_v29  ;;  %v588_v35 = vor.u32 %v776_v32, %v585_v33  ;;  %v792_v36 = vld [vmem:[#allocation2 + $0x84] sm:$0xf]  ;;  %v649_v37 = vld [vmem:[#allocation2 + $0x88] sm:$0xf0]  ;;  %v823_v39 = vld [vmem:[#allocation4 + $0x78] sm:$0xff] }
  0x24   :  { %366 = vmatpush.bf16.msrb.mxu1 %v676_v2  ;;  %v652_v38 = vor.u32 %v792_v36, %v649_v37  ;;  %v815_v40 = vld [vmem:[#allocation4 + $0x38] sm:$0xff]  ;;  %v822_v41 = vld [vmem:[#allocation4 + $0x70] sm:$0xff]  ;;  %v821_v43 = vld [vmem:[#allocation4 + $0x68] sm:$0xff] }
  0x25   :  { %325 = vmatpush.bf16.msra.mxu2 %v600_v5  ;;  %v814_v42 = vld [vmem:[#allocation4 + $0x30] sm:$0xff]  ;;  %v820_v44 = vld [vmem:[#allocation4 + $0x60] sm:$0xff]  ;;  %v813_v62 = vld [vmem:[#allocation4 + $0x28] sm:$0xff] }
  0x26   :  { %339 = vmatpush.bf16.msra.mxu3 %v664_v9  ;;  %v63_v45 = vld [vmem:[%s975_s2] sm:$0x3]  ;;  %v819_v63 = vld [vmem:[#allocation4 + $0x58] sm:$0xff]  ;;  %v818_v1 = vld [vmem:[#allocation4 + $0x50] sm:$0xff] }
  0x27   :  { %353 = vmatpush.bf16.msrb.mxu0 %v604_v13  ;;  %v65_v48 = vperm.slane %v63_v45, 0  ;;  %v66_v49 = vperm.slane %v63_v45, 1  ;;  %v812_v0 = vld [vmem:[#allocation4 + $0x20] sm:$0xff]  ;;  %v811_v2 = vld [vmem:[#allocation4 + $0x18] sm:$0xff]  ;;  %v817_v3 = vld [vmem:[#allocation4 + $0x48] sm:$0xff] }
  0x28   :  { %367 = vmatpush.bf16.msrb.mxu1 %v668_v14  ;;  %v810_v4 = vld [vmem:[#allocation4 + $0x10] sm:$0xff]  ;;  %v816_v5 = vld [vmem:[#allocation4 + $0x40] sm:$0xff]  ;;  %v809_v6 = vld [vmem:[#allocation4 + $0x8] sm:$0xff] }
  0x29   :  { %326 = vmatpush.bf16.msra.mxu2 %v592_v18  ;;  %v808_v7 = vld [vmem:[#allocation4] sm:$0xff] }
  0x2a   :  { %340 = vmatpush.bf16.msra.mxu3 %v656_v22  ;;  %v154_v8 = vld [vmem:[%s977_s4] sm:$0x3] }
  0x2b   :  { %354 = vmatpush.bf16.msrb.mxu0 %v596_v23  ;;  %v157_v10 = vperm.slane %v154_v8, 1  ;;  %v156_v14 = vperm.slane %v154_v8, 0  ;;  %v835_v33 = vld [vmem:[%s979_s6] ss:$0 sm:$0xff] }
  0x2c   :  { %368 = vmatpush.bf16.msrb.mxu1 %v660_v26 }
  0x2d   :  { %327 = vmatpush.bf16.msra.mxu2 %v584_v30 }
  0x2e   :  { %341 = vmatpush.bf16.msra.mxu3 %v648_v34 }
  0x2f   :  { %355 = vmatpush.bf16.msrb.mxu0 %v588_v35 }
  0x30   :  { %369 = vmatpush.bf16.msrb.mxu1 %v652_v38 }
  0x31   :  { %514 = vmatpush.bf16.msrb.mxu2 %v815_v40 }
  0x32   :  { %528 = vmatpush.bf16.msrb.mxu3 %v823_v39 }
  0x35   :  { %515 = vmatpush.bf16.msrb.mxu2 %v814_v42 }
  0x36   :  { %529 = vmatpush.bf16.msrb.mxu3 %v822_v41 }
  0x39   :  { %516 = vmatpush.bf16.msrb.mxu2 %v813_v62 }
  0x3a   :  { %530 = vmatpush.bf16.msrb.mxu3 %v821_v43 }
  0x3d   :  { %517 = vmatpush.bf16.msrb.mxu2 %v812_v0 }
  0x3e   :  { %531 = vmatpush.bf16.msrb.mxu3 %v820_v44  ;;  %v542_v44 = vlaneseq }
  0x41   :  { %518 = vmatpush.bf16.msrb.mxu2 %v811_v2 }
  0x42   :  { %532 = vmatpush.bf16.msrb.mxu3 %v819_v63 }
  0x45   :  { %519 = vmatpush.bf16.msrb.mxu2 %v810_v4 }
  0x46   :  { %533 = vmatpush.bf16.msrb.mxu3 %v818_v1 }
  0x49   :  { %520 = vmatpush.bf16.msrb.mxu2 %v809_v6 }
  0x4a   :  { %534 = vmatpush.bf16.msrb.mxu3 %v817_v3 }
  0x4d   :  { %521 = vmatpush.bf16.msrb.mxu2 %v808_v7 }
  0x4e   :  { %535 = vmatpush.bf16.msrb.mxu3 %v816_v5 }
  0x8f   :  { %v97_v46 = vpop.f32.mrf.mxu0 }
  0x90   :  { %v111_v47 = vpop.f32.mrf.mxu1  ;;  %v98_v50 = vadd.f32 %v97_v46, %v65_v48 }
  0x91   :  { %v112_v51 = vadd.f32 %v111_v47, %v66_v49 }
  0x92   :  { %v116_v56 = vmax.f32 %v98_v50, 0.0 }
  0x93   :  { %v117_v58 = vmax.f32 %v112_v51, 0.0 }
  0x97   :  { %v99_v52 = vpop.f32.mrf.mxu0 }
  0x98   :  { %v100_v53 = vadd.f32 %v99_v52, %v65_v48  ;;  %v113_v54 = vpop.f32.mrf.mxu1  ;;  %v543_v48 = vand.u32 127, %v542_v44 }
  0x99   :  { %v114_v55 = vadd.f32 %v113_v54, %v66_v49 }
  0x9a   :  { %v118_v57 = vmax.f32 %v100_v53, 0.0  ;;  %vm552_vm1 = vcmp.ge.s32.totalorder %v543_v48, 2  ;;  %vm553_vm2 = vcmp.lt.s32.totalorder %v543_v48, 4 }
  0x9b   :  { %v119_v59 = vmax.f32 %v114_v55, 0.0  ;;  %vm554_vm3 = vmand %vm552_vm1, %vm553_vm2 }
  0x9c   :  { %v120_v60 = vpack.c.bf16 %v118_v57, %v116_v56 }
  0x9d   :  { %v121_v61 = vpack.c.bf16 %v119_v59, %v117_v58 }
  0x9e   :  { %328 = vmatmul.bf16.vlgmr.msra.gmra.mxu2 %v120_v60  ;;  %356 = vmatmul.bf16.vlgmr.msrb.gmra.mxu0 %v120_v60 }
  0x9f   :  { %342 = vmatmul.bf16.vlgmr.msra.gmra.mxu3 %v121_v61  ;;  %370 = vmatmul.bf16.vlgmr.msrb.gmra.mxu1 %v121_v61 }
 0x11b   :  { %v357_v9 = vpop.f32.mrf.mxu0 }
 0x11c   :  { %v371_v11 = vpop.f32.mrf.mxu1  ;;  %v358_v12 = vadd.f32 %v357_v9, %v157_v10 }
 0x11e   :  { %v372_v17 = vadd.f32 %v371_v11, %v358_v12 }
 0x120   :  { %v377_v22 = vmax.f32 %v372_v17, 0.0 }
 0x121   :  { %v329_v13 = vpop.f32.mrf.mxu2 }
 0x122   :  { %v343_v15 = vpop.f32.mrf.mxu3  ;;  %v330_v20 = vadd.f32 %v329_v13, %v156_v14 }
 0x123   :  { %v359_v16 = vpop.f32.mrf.mxu0 }
 0x124   :  { %v360_v18 = vadd.f32 %v359_v16, %v157_v10  ;;  %v373_v19 = vpop.f32.mrf.mxu1  ;;  %v344_v25 = vadd.f32 %v343_v15, %v330_v20 }
 0x126   :  { %v374_v21 = vadd.f32 %v373_v19, %v360_v18  ;;  %v376_v30 = vmax.f32 %v344_v25, 0.0 }
 0x128   :  { %v379_v23 = vmax.f32 %v374_v21, 0.0 }
 0x129   :  { %v331_v24 = vpop.f32.mrf.mxu2 }
 0x12a   :  { %v381_v26 = vpack.c.bf16 %v379_v23, %v377_v22  ;;  %v332_v27 = vadd.f32 %v331_v24, %v156_v14  ;;  %v345_v28 = vpop.f32.mrf.mxu3 }
 0x12c   :  { %v346_v29 = vadd.f32 %v345_v28, %v332_v27  ;;  %536 = vmatmul.bf16.vlgmr.msrb.gmra.mxu3 %v381_v26 }
 0x12e   :  { %v378_v31 = vmax.f32 %v346_v29, 0.0 }
 0x130   :  { %v380_v32 = vpack.c.bf16 %v378_v31, %v376_v30 }
 0x132   :  { %522 = vmatmul.bf16.vlgmr.msrb.gmra.mxu2 %v380_v32 }
 0x1af   :  { %v537_v34 = vpop.f32.mrf.mxu3 }
 0x1b5   :  { %v523_v35 = vpop.f32.mrf.mxu2 }
 0x1b6   :  { %v524_v36 = vadd.f32 %v835_v33, %v523_v35 }
 0x1b7   :  { %v539_v42 = vpop.f32.mrf.mxu3 }
 0x1b8   :  { %v538_v37 = vadd.f32 %v537_v34, %v524_v36 }
 0x1ba   :  { %v544_v38 = vmax.f32 %v538_v37, -20.0 }
 0x1bc   :  { %v546_v40 = vmin.f32 %v544_v38, 2.0 }
 0x1bd   :  { %v525_v39 = vpop.f32.mrf.mxu2 }
 0x1be   :  { %v526_v41 = vadd.f32 %v835_v33, %v525_v39  ;;  %v548_v45 = vmul.f32 1.442695, %v546_v40 }
 0x1c0   :  { %v540_v43 = vadd.f32 %v539_v42, %v526_v41  ;;  %836 = vpow2.f32 %v548_v45 }
 0x1c2   :  { %v545_v46 = vmax.f32 %v540_v43, -20.0 }
 0x1c4   :  { %v547_v47 = vmin.f32 %v545_v46, 2.0 }
 0x1c6   :  { %v550_v49 = vmul.f32 1.442695, %v547_v47  ;;  %v837_v50 = vpop.eup %836 }
 0x1c7   :  { %v555_v52 = vsel %vm554_vm3, %v837_v50, %v538_v37 }
 0x1c8   :  { %838 = vpow2.f32 %v550_v49 }
 0x1ce   :  { %v839_v51 = vpop.eup %838 }
 0x1cf   :  { %v556_v53 = vsel %vm554_vm3, %v839_v51, %v540_v43 }
 0x1d0   :  { %v827_v54 = vpack.c.bf16 %v556_v53, %v555_v52 }
 0x1d2   :  { %828 = vst [vmem:[%s980_s7] sm:$0xff] %v827_v54  }
 0x1d3   :  { %565 = vsyncpa [#allocation3], 1 }
 0x1d4   :  { %566 = vsyncpa [#allocation5], 1 }

</bundles_post_ra>
